<compile_context>
chip_gen: v5e
topology: v5e:2x2
jax: 0.10.0
libtpu: 0.0.40
codegen_flags: <defaults>
</compile_context>

<pallas_src>
import functools

import jax
import jax.numpy as jnp
from jax.experimental import pallas as pl
from jax.experimental.pallas import tpu as pltpu

_LANES = 128
_MAX_TILE_ROWS = 2048   # 8 lane-padded streams, double-buffered, << 32 MiB scoped VMEM
_ROW_ALIGN = 32         # covers the (32, 128) minimum tile of int8 labels


def _round_up(n, m):
    return ((n + m - 1) // m) * m


def _is_hard_dtype(dt):
    return jnp.issubdtype(dt, jnp.integer) or jnp.issubdtype(dt, jnp.bool_)


def _default_splits():
    """2 on chips with two TensorCores (v4/v5p megacore, v7x), else 1."""
    try:
        kind = jax.devices()[0].device_kind.lower()
    except Exception:
        return 1
    return 2 if any(tag in kind for tag in ("v4", "v5p", "v7", "7x")) else 1


def _elem_term(x_ref, y_ref, *, hard_labels, from_logits):
    """Per-element contribution for one (output, label) pair.

    probs path : returns the clamped log-likelihood max(log p(y|x), -100);
                 the elementwise negate of BCE is folded into the sign of the
                 SMEM weight (one VALU op saved per element).
    logits path: returns the positive, numerically stable BCE-with-logits.
    """
    y = y_ref[...]
    if from_logits:
        z = x_ref[...].astype(jnp.float32)
        yf = y.astype(jnp.float32)
        return jnp.maximum(z, 0.0) - yf * z + jnp.log(1.0 + jnp.exp(-jnp.abs(z)))

    x = x_ref[...].astype(jnp.float32)
    if hard_labels:
        if jnp.issubdtype(y.dtype, jnp.floating):
            pos = y > jnp.asarray(0.5, y.dtype)      # compare in native dtype
        else:
            pos = y.astype(jnp.int32) != 0           # cheap unpack -> 32-bit mask
        sel = jnp.where(pos, x, 1.0 - x)
        return jnp.maximum(jnp.log(sel), -100.0)     # PyTorch BCE clamp
    yf = y.astype(jnp.float32)
    lx = jnp.maximum(jnp.log(x), -100.0)
    l1x = jnp.maximum(jnp.log(1.0 - x), -100.0)
    return l1x + yf * (lx - l1x)                     # = y*log(x) + (1-y)*log(1-x)


def _hybrid_loss_kernel(w_ref,
                        xts_ref, yts_ref, xte_ref, yte_ref,
                        xas_ref, yas_ref, xae_ref, yae_ref,
                        out_ref, acc_t_ref, acc_a_ref, *,
                        rows, needs_mask, hard_labels, from_logits):
    p = pl.program_id(0)            # TensorCore split ("parallel")
    t = pl.program_id(1)            # row tile within the split ("arbitrary")
    ntph = pl.num_programs(1)

    @pl.when(t == 0)
    def _():
        acc_t_ref[...] = jnp.zeros_like(acc_t_ref)
        acc_a_ref[...] = jnp.zeros_like(acc_a_ref)

    term = functools.partial(_elem_term, hard_labels=hard_labels,
                             from_logits=from_logits)
    pt = term(xts_ref, yts_ref) + term(xte_ref, yte_ref)   # (tile_rows, n_events)
    pa = term(xas_ref, yas_ref) + term(xae_ref, yae_ref)   # (tile_rows, n_roles)

    if needs_mask:
        # Zero rows beyond the true row count (partial/oversized tile, or the
        # duplicated overflow tile of an uneven 2-way split).
        tile_rows = pt.shape[0]
        row0 = (p * ntph + t) * tile_rows
        valid = jax.lax.broadcasted_iota(jnp.int32, (tile_rows, 1), 0) + row0 < rows
        pt = jnp.where(valid, pt, 0.0)
        pa = jnp.where(valid, pa, 0.0)

    # Sublane tree-reduce each tile to a single (8, n) vreg (pure VALU adds),
    # then one tiny accumulator RMW per pair family (no full-tile RMW).
    acc_t_ref[...] += pt.reshape(-1, 8, pt.shape[-1]).sum(axis=0)
    acc_a_ref[...] += pa.reshape(-1, 8, pa.shape[-1]).sum(axis=0)

    @pl.when(t == ntph - 1)
    def _():
        # Single cross-lane reduce + weighting + lane-dense write per split.
        total = (w_ref[0] * jnp.sum(acc_t_ref[...])
                 + w_ref[1] * jnp.sum(acc_a_ref[...]))
        out_ref[...] = jnp.broadcast_to(total, out_ref.shape)


def plmee_hybrid_loss(trigger_output_start, trigger_output_end,
                      trigger_label_start, trigger_label_end,
                      argument_output_start, argument_output_end,
                      argument_label_start, argument_label_end,
                      lam=0.6, hard_labels=None, from_logits=False,
                      tile_rows=None, splits=None):
    """Hybrid BCE loss of PLMEE_Hybrid, computed by one Pallas kernel.

    hard_labels: True  -> labels assumed to be exactly {0,1} (single-log path).
                 False -> exact soft-label BCE.
                 None  -> inferred from the label dtypes (integer/bool = hard).
    from_logits: outputs are pre-sigmoid logits; stable BCE-with-logits is
                 computed in-kernel (no -100 clamp needed).
    """
    def to2d(a):
        a = jnp.asarray(a)
        return a.reshape(-1, a.shape[-1])

    xts, xte = to2d(trigger_output_start), to2d(trigger_output_end)
    yts, yte = to2d(trigger_label_start), to2d(trigger_label_end)
    xas, xae = to2d(argument_output_start), to2d(argument_output_end)
    yas, yae = to2d(argument_label_start), to2d(argument_label_end)

    rows, n_events = xts.shape
    n_roles = xas.shape[-1]
    assert xte.shape == yts.shape == yte.shape == (rows, n_events)
    assert xae.shape == yas.shape == yae.shape == (rows, n_roles)

    if hard_labels is None:
        hard_labels = all(_is_hard_dtype(y.dtype) for y in (yts, yte, yas, yae))

    def fix_label(y):   # bool -> int8 so the label stream tiles cleanly (1 B/elem)
        return y.astype(jnp.int8) if jnp.issubdtype(y.dtype, jnp.bool_) else y
    yts, yte, yas, yae = map(fix_label, (yts, yte, yas, yae))

    if tile_rows is None:
        tile_rows = min(_MAX_TILE_ROWS, _round_up(rows, _ROW_ALIGN))
    tile_rows = _round_up(int(tile_rows), _ROW_ALIGN)

    num_tiles = pl.cdiv(rows, tile_rows)
    if splits is None:
        splits = _default_splits()
    splits = max(1, min(int(splits), num_tiles))
    ntph = pl.cdiv(num_tiles, splits)             # row tiles per split
    padded_tiles = splits * ntph
    needs_mask = (padded_tiles * tile_rows != rows)
    clamp = (padded_tiles != num_tiles)
    last_block = num_tiles - 1

    def row_map(p, t, w):                          # w = SMEM prefetch ref (unused)
        idx = p * ntph + t
        if clamp:                                  # overflow tile re-reads the last
            idx = jnp.minimum(idx, last_block)     # real tile (no extra DMA) and is
        return (idx, 0)                            # fully masked in the kernel.

    spec_t = pl.BlockSpec((tile_rows, n_events), row_map)
    spec_a = pl.BlockSpec((tile_rows, n_roles), row_map)

    # Per-family weights in SMEM (scalar prefetch): lam/N_t and (1-lam)/N_a,
    # negated on the probability paths so the kernel never negates per element.
    lam_f = jnp.asarray(lam, jnp.float32)
    sign = jnp.float32(1.0) if from_logits else jnp.float32(-1.0)
    weights = jnp.stack([sign * lam_f / float(rows * n_events),
                         sign * (1.0 - lam_f) / float(rows * n_roles)]
                        ).astype(jnp.float32)

    grid_spec = pltpu.PrefetchScalarGridSpec(
        num_scalar_prefetch=1,
        grid=(splits, ntph),
        in_specs=[spec_t, spec_t, spec_t, spec_t,
                  spec_a, spec_a, spec_a, spec_a],
        out_specs=pl.BlockSpec((1, 8, _LANES), lambda p, t, w: (p, 0, 0)),
        scratch_shapes=[pltpu.VMEM((8, n_events), jnp.float32),
                        pltpu.VMEM((8, n_roles), jnp.float32)],
    )

    kernel = functools.partial(_hybrid_loss_kernel, rows=rows,
                               needs_mask=needs_mask, hard_labels=hard_labels,
                               from_logits=from_logits)

    partials = pl.pallas_call(
        kernel,
        out_shape=jax.ShapeDtypeStruct((splits, 8, _LANES), jnp.float32),
        grid_spec=grid_spec,
        compiler_params=pltpu.CompilerParams(
            dimension_semantics=("parallel", "arbitrary")),
    )(weights, xts, yts, xte, yte, xas, yas, xae, yae)

    return jnp.sum(partials[:, 0, 0])


def _reference_loss(trigger_output_start, trigger_output_end,
                    trigger_label_start, trigger_label_end,
                    argument_output_start, argument_output_end,
                    argument_label_start, argument_label_end, lam=0.6):
    def bce(x, y):
        x = jnp.asarray(x, jnp.float32)
        y = jnp.asarray(y, jnp.float32)
        lx = jnp.maximum(jnp.log(x), -100.0)
        l1x = jnp.maximum(jnp.log(1.0 - x), -100.0)
        return jnp.mean(-(y * lx + (1.0 - y) * l1x))
    t = bce(trigger_output_start, trigger_label_start) + bce(trigger_output_end, trigger_label_end)
    a = bce(argument_output_start, argument_label_start) + bce(argument_output_end, argument_label_end)
    return lam * t + (1.0 - lam) * a


def _reference_loss_logits(trigger_output_start, trigger_output_end,
                           trigger_label_start, trigger_label_end,
                           argument_output_start, argument_output_end,
                           argument_label_start, argument_label_end, lam=0.6):
    def bce(z, y):
        z = jnp.asarray(z, jnp.float32)
        y = jnp.asarray(y, jnp.float32)
        return jnp.mean(jnp.maximum(z, 0.0) - y * z
                        + jnp.log(1.0 + jnp.exp(-jnp.abs(z))))
    t = bce(trigger_output_start, trigger_label_start) + bce(trigger_output_end, trigger_label_end)
    a = bce(argument_output_start, argument_label_start) + bce(argument_output_end, argument_label_end)
    return lam * t + (1.0 - lam) * a


if __name__ == "__main__":
    n_events, n_roles = 10, 18      # len(event_types), len(role_types)
    lam = 0.6

    def make_inputs(key, batch, seq, logits=False):
        ks = jax.random.split(key, 8)
        def out(k, n):
            z = jax.random.normal(k, (batch, seq, n), jnp.float32)
            return z if logits else jax.nn.sigmoid(z)
        def hard(k, n, p):
            return jax.random.bernoulli(k, p, (batch, seq, n)).astype(jnp.int8)
        return dict(
            trigger_output_start=out(ks[0], n_events),
            trigger_output_end=out(ks[1], n_events),
            trigger_label_start=hard(ks[2], n_events, 0.3),
            trigger_label_end=hard(ks[3], n_events, 0.3),
            argument_output_start=out(ks[4], n_roles),
            argument_output_end=out(ks[5], n_roles),
            argument_label_start=hard(ks[6], n_roles, 0.2),
            argument_label_end=hard(ks[7], n_roles, 0.2),
        )

    def check(name, got, want, rtol=1e-5, atol=1e-5):
        got = float(got)
        want = float(want)
        assert abs(got - want) <= atol + rtol * abs(want), (name, got, want)

    key = jax.random.PRNGKey(0)
    k1, k2, k3, k4 = jax.random.split(key, 4)

    # 1) Module-shaped small case (bsz=2, seq_l=8): hard int8 labels, single
    #    (oversized) tile, default core splits.
    inp = make_inputs(k1, 2, 8)
    got = jax.block_until_ready(plmee_hybrid_loss(**inp, lam=lam))
    check("small-hard", got, _reference_loss(**inp, lam=lam))

    # 2) Multi-tile + forced 2-way core split + partial last tile (mask path).
    inp = make_inputs(k2, 1, 590)
    got = jax.block_until_ready(
        plmee_hybrid_loss(**inp, lam=lam, tile_rows=64, splits=2))
    check("multi-tile-split", got, _reference_loss(**inp, lam=lam))

    # 3) Soft float labels + odd tile count (clamped, fully-masked overflow tile).
    inp = make_inputs(k3, 1, 576)
    ksoft = jax.random.split(k3, 4)
    for i, name in enumerate(("trigger_label_start", "trigger_label_end",
                              "argument_label_start", "argument_label_end")):
        n = n_events if "trigger" in name else n_roles
        inp[name] = jax.random.uniform(ksoft[i], (1, 576, n), jnp.float32)
    got = jax.block_until_ready(
        plmee_hybrid_loss(**inp, lam=lam, tile_rows=64, splits=2))
    check("soft-odd-tiles", got, _reference_loss(**inp, lam=lam))

    # 4) Fused BCE-with-logits path (heads emit logits; no -100 clamp needed).
    inp = make_inputs(k4, 2, 8, logits=True)
    got = jax.block_until_ready(
        plmee_hybrid_loss(**inp, lam=lam, from_logits=True))
    check("from-logits", got, _reference_loss_logits(**inp, lam=lam))

    print("KERNEL_OK")
</pallas_src>

<mosaic_0001>
module attributes {stable_mosaic.version = 11 : i64} {
  func.func @_hybrid_loss_kernel(%arg0: i32, %arg1: i32, %arg2: memref<2xf32, #tpu.memory_space<smem>>, %arg3: memref<32x10xf32, #tpu.memory_space<vmem>>, %arg4: memref<32x10xi8, #tpu.memory_space<vmem>>, %arg5: memref<32x10xf32, #tpu.memory_space<vmem>>, %arg6: memref<32x10xi8, #tpu.memory_space<vmem>>, %arg7: memref<32x18xf32, #tpu.memory_space<vmem>>, %arg8: memref<32x18xi8, #tpu.memory_space<vmem>>, %arg9: memref<32x18xf32, #tpu.memory_space<vmem>>, %arg10: memref<32x18xi8, #tpu.memory_space<vmem>>, %arg11: memref<1x8x128xf32, #tpu.memory_space<vmem>>, %arg12: memref<8x10xf32, #tpu.memory_space<vmem>>, %arg13: memref<8x18xf32, #tpu.memory_space<vmem>>) attributes {dimension_semantics = [#tpu.dimension_semantics<parallel>, #tpu.dimension_semantics<arbitrary>], iteration_bounds = array<i64: 1, 1>, scalar_prefetch = 1 : i64, scratch_operands = 2 : i64, tpu.core_type = #tpu.core_type<tc>, window_params = [{transform_indices = @transform_0, window_bounds = array<i64: 32, 10>}, {transform_indices = @transform_1, window_bounds = array<i64: 32, 10>}, {transform_indices = @transform_2, window_bounds = array<i64: 32, 10>}, {transform_indices = @transform_3, window_bounds = array<i64: 32, 10>}, {transform_indices = @transform_4, window_bounds = array<i64: 32, 18>}, {transform_indices = @transform_5, window_bounds = array<i64: 32, 18>}, {transform_indices = @transform_6, window_bounds = array<i64: 32, 18>}, {transform_indices = @transform_7, window_bounds = array<i64: 32, 18>}, {transform_indices = @transform_8, window_bounds = array<i64: 1, 8, 128>}]} {
    %c0_i32 = arith.constant 0 : i32
    %0 = arith.cmpi eq, %arg1, %c0_i32 : i32
    %1 = arith.extui %0 : i1 to i32
    %c0_i32_0 = arith.constant 0 : i32
    %2 = arith.cmpi ne, %1, %c0_i32_0 : i32
    scf.if %2 {
      %cst_41 = arith.constant 0.000000e+00 : f32
      %78 = vector.broadcast %cst_41 : f32 to vector<8x10xf32>
      %c0_42 = arith.constant 0 : index
      %c0_43 = arith.constant 0 : index
      %79 = vector.load %arg12[%c0_42, %c0_43] : memref<8x10xf32, #tpu.memory_space<vmem>>, vector<8x10xf32>
      tpu.vector_store %arg12[%c0_42, %c0_43], %78 {strides = array<i32>} : memref<8x10xf32, #tpu.memory_space<vmem>>, vector<8x10xf32>,
      %cst_44 = arith.constant 0.000000e+00 : f32
      %80 = vector.broadcast %cst_44 : f32 to vector<8x18xf32>
      %c0_45 = arith.constant 0 : index
      %c0_46 = arith.constant 0 : index
      %81 = vector.load %arg13[%c0_45, %c0_46] : memref<8x18xf32, #tpu.memory_space<vmem>>, vector<8x18xf32>
      tpu.vector_store %arg13[%c0_45, %c0_46], %80 {strides = array<i32>} : memref<8x18xf32, #tpu.memory_space<vmem>>, vector<8x18xf32>,
    } else {
    }
    %c0 = arith.constant 0 : index
    %c0_1 = arith.constant 0 : index
    %3 = vector.load %arg4[%c0, %c0_1] : memref<32x10xi8, #tpu.memory_space<vmem>>, vector<32x10xi8>
    %c0_2 = arith.constant 0 : index
    %c0_3 = arith.constant 0 : index
    %4 = vector.load %arg3[%c0_2, %c0_3] : memref<32x10xf32, #tpu.memory_space<vmem>>, vector<32x10xf32>
    %5 = arith.extsi %3 : vector<32x10xi8> to vector<32x10xi32>
    %c0_i32_4 = arith.constant 0 : i32
    %6 = vector.broadcast %c0_i32_4 : i32 to vector<32x10xi32>
    %7 = arith.cmpi ne, %5, %6 : vector<32x10xi32>
    %cst = arith.constant 1.000000e+00 : f32
    %8 = vector.broadcast %cst : f32 to vector<32x10xf32>
    %9 = arith.subf %8, %4 : vector<32x10xf32>
    %10 = arith.select %7, %4, %9 : vector<32x10xi1>, vector<32x10xf32>
    %11 = math.log %10 : vector<32x10xf32>
    %cst_5 = arith.constant -1.000000e+02 : f32
    %12 = vector.broadcast %cst_5 : f32 to vector<32x10xf32>
    %13 = arith.maximumf %11, %12 : vector<32x10xf32>
    %c0_6 = arith.constant 0 : index
    %c0_7 = arith.constant 0 : index
    %14 = vector.load %arg6[%c0_6, %c0_7] : memref<32x10xi8, #tpu.memory_space<vmem>>, vector<32x10xi8>
    %c0_8 = arith.constant 0 : index
    %c0_9 = arith.constant 0 : index
    %15 = vector.load %arg5[%c0_8, %c0_9] : memref<32x10xf32, #tpu.memory_space<vmem>>, vector<32x10xf32>
    %16 = arith.extsi %14 : vector<32x10xi8> to vector<32x10xi32>
    %c0_i32_10 = arith.constant 0 : i32
    %17 = vector.broadcast %c0_i32_10 : i32 to vector<32x10xi32>
    %18 = arith.cmpi ne, %16, %17 : vector<32x10xi32>
    %cst_11 = arith.constant 1.000000e+00 : f32
    %19 = vector.broadcast %cst_11 : f32 to vector<32x10xf32>
    %20 = arith.subf %19, %15 : vector<32x10xf32>
    %21 = arith.select %18, %15, %20 : vector<32x10xi1>, vector<32x10xf32>
    %22 = math.log %21 : vector<32x10xf32>
    %cst_12 = arith.constant -1.000000e+02 : f32
    %23 = vector.broadcast %cst_12 : f32 to vector<32x10xf32>
    %24 = arith.maximumf %22, %23 : vector<32x10xf32>
    %25 = arith.addf %13, %24 : vector<32x10xf32>
    %c0_13 = arith.constant 0 : index
    %c0_14 = arith.constant 0 : index
    %26 = vector.load %arg8[%c0_13, %c0_14] : memref<32x18xi8, #tpu.memory_space<vmem>>, vector<32x18xi8>
    %c0_15 = arith.constant 0 : index
    %c0_16 = arith.constant 0 : index
    %27 = vector.load %arg7[%c0_15, %c0_16] : memref<32x18xf32, #tpu.memory_space<vmem>>, vector<32x18xf32>
    %28 = arith.extsi %26 : vector<32x18xi8> to vector<32x18xi32>
    %c0_i32_17 = arith.constant 0 : i32
    %29 = vector.broadcast %c0_i32_17 : i32 to vector<32x18xi32>
    %30 = arith.cmpi ne, %28, %29 : vector<32x18xi32>
    %cst_18 = arith.constant 1.000000e+00 : f32
    %31 = vector.broadcast %cst_18 : f32 to vector<32x18xf32>
    %32 = arith.subf %31, %27 : vector<32x18xf32>
    %33 = arith.select %30, %27, %32 : vector<32x18xi1>, vector<32x18xf32>
    %34 = math.log %33 : vector<32x18xf32>
    %cst_19 = arith.constant -1.000000e+02 : f32
    %35 = vector.broadcast %cst_19 : f32 to vector<32x18xf32>
    %36 = arith.maximumf %34, %35 : vector<32x18xf32>
    %c0_20 = arith.constant 0 : index
    %c0_21 = arith.constant 0 : index
    %37 = vector.load %arg10[%c0_20, %c0_21] : memref<32x18xi8, #tpu.memory_space<vmem>>, vector<32x18xi8>
    %c0_22 = arith.constant 0 : index
    %c0_23 = arith.constant 0 : index
    %38 = vector.load %arg9[%c0_22, %c0_23] : memref<32x18xf32, #tpu.memory_space<vmem>>, vector<32x18xf32>
    %39 = arith.extsi %37 : vector<32x18xi8> to vector<32x18xi32>
    %c0_i32_24 = arith.constant 0 : i32
    %40 = vector.broadcast %c0_i32_24 : i32 to vector<32x18xi32>
    %41 = arith.cmpi ne, %39, %40 : vector<32x18xi32>
    %cst_25 = arith.constant 1.000000e+00 : f32
    %42 = vector.broadcast %cst_25 : f32 to vector<32x18xf32>
    %43 = arith.subf %42, %38 : vector<32x18xf32>
    %44 = arith.select %41, %38, %43 : vector<32x18xi1>, vector<32x18xf32>
    %45 = math.log %44 : vector<32x18xf32>
    %cst_26 = arith.constant -1.000000e+02 : f32
    %46 = vector.broadcast %cst_26 : f32 to vector<32x18xf32>
    %47 = arith.maximumf %45, %46 : vector<32x18xf32>
    %48 = arith.addf %36, %47 : vector<32x18xf32>
    %c1_i32 = arith.constant 1 : i32
    %49 = arith.muli %arg0, %c1_i32 : i32
    %50 = arith.addi %49, %arg1 : i32
    %c32_i32 = arith.constant 32 : i32
    %51 = arith.muli %50, %c32_i32 : i32
    %52 = tpu.iota {dimensions = array<i32: 0>} : vector<32x1xi32>
    %53 = vector.broadcast %51 : i32 to vector<32x1xi32>
    %54 = arith.addi %52, %53 : vector<32x1xi32>
    %c16_i32 = arith.constant 16 : i32
    %55 = vector.broadcast %c16_i32 : i32 to vector<32x1xi32>
    %56 = arith.cmpi slt, %54, %55 : vector<32x1xi32>
    %cst_27 = arith.constant 0.000000e+00 : f32
    %57 = vector.shape_cast %56 : vector<32x1xi1> to vector<32x1xi1>
    %58 = vector.broadcast %57 : vector<32x1xi1> to vector<32x10xi1>
    %59 = vector.broadcast %cst_27 : f32 to vector<32x10xf32>
    %60 = arith.select %58, %25, %59 : vector<32x10xi1>, vector<32x10xf32>
    %cst_28 = arith.constant 0.000000e+00 : f32
    %61 = vector.shape_cast %56 : vector<32x1xi1> to vector<32x1xi1>
    %62 = vector.broadcast %61 : vector<32x1xi1> to vector<32x18xi1>
    %63 = vector.broadcast %cst_28 : f32 to vector<32x18xf32>
    %64 = arith.select %62, %48, %63 : vector<32x18xi1>, vector<32x18xf32>
    %c0_29 = arith.constant 0 : index
    %c0_30 = arith.constant 0 : index
    %65 = vector.load %arg12[%c0_29, %c0_30] : memref<8x10xf32, #tpu.memory_space<vmem>>, vector<8x10xf32>
    %66 = vector.shape_cast %60 : vector<32x10xf32> to vector<4x8x10xf32>
    %cst_31 = arith.constant dense<0.000000e+00> : vector<8x10xf32>
    %67 = vector.multi_reduction <add>, %66, %cst_31 [0] : vector<4x8x10xf32> to vector<8x10xf32>
    %68 = arith.addf %65, %67 : vector<8x10xf32>
    %c0_32 = arith.constant 0 : index
    %c0_33 = arith.constant 0 : index
    %69 = vector.load %arg12[%c0_32, %c0_33] : memref<8x10xf32, #tpu.memory_space<vmem>>, vector<8x10xf32>
    tpu.vector_store %arg12[%c0_32, %c0_33], %68 {strides = array<i32>} : memref<8x10xf32, #tpu.memory_space<vmem>>, vector<8x10xf32>,
    %c0_34 = arith.constant 0 : index
    %c0_35 = arith.constant 0 : index
    %70 = vector.load %arg13[%c0_34, %c0_35] : memref<8x18xf32, #tpu.memory_space<vmem>>, vector<8x18xf32>
    %71 = vector.shape_cast %64 : vector<32x18xf32> to vector<4x8x18xf32>
    %cst_36 = arith.constant dense<0.000000e+00> : vector<8x18xf32>
    %72 = vector.multi_reduction <add>, %71, %cst_36 [0] : vector<4x8x18xf32> to vector<8x18xf32>
    %73 = arith.addf %70, %72 : vector<8x18xf32>
    %c0_37 = arith.constant 0 : index
    %c0_38 = arith.constant 0 : index
    %74 = vector.load %arg13[%c0_37, %c0_38] : memref<8x18xf32, #tpu.memory_space<vmem>>, vector<8x18xf32>
    tpu.vector_store %arg13[%c0_37, %c0_38], %73 {strides = array<i32>} : memref<8x18xf32, #tpu.memory_space<vmem>>, vector<8x18xf32>,
    %c0_i32_39 = arith.constant 0 : i32
    %75 = arith.cmpi eq, %arg1, %c0_i32_39 : i32
    %76 = arith.extui %75 : i1 to i32
    %c0_i32_40 = arith.constant 0 : i32
    %77 = arith.cmpi ne, %76, %c0_i32_40 : i32
    scf.if %77 {
      %c0_41 = arith.constant 0 : index
      %78 = memref.load %arg2[%c0_41] : memref<2xf32, #tpu.memory_space<smem>>
      %c0_42 = arith.constant 0 : index
      %c0_43 = arith.constant 0 : index
      %79 = vector.load %arg12[%c0_42, %c0_43] : memref<8x10xf32, #tpu.memory_space<vmem>>, vector<8x10xf32>
      %80 = vector.shape_cast %79 : vector<8x10xf32> to vector<1x8x10xf32>
      %cst_44 = arith.constant dense<0.000000e+00> : vector<1xf32>
      %81 = vector.multi_reduction <add>, %80, %cst_44 [1, 2] : vector<1x8x10xf32> to vector<1xf32>
      %82 = vector.shape_cast %81 : vector<1xf32> to vector<1x1x1xf32>
      %83 = vector.extract %82[0, 0, 0] : f32 from vector<1x1x1xf32>
      %84 = arith.mulf %78, %83 : f32
      %c1 = arith.constant 1 : index
      %85 = memref.load %arg2[%c1] : memref<2xf32, #tpu.memory_space<smem>>
      %c0_45 = arith.constant 0 : index
      %c0_46 = arith.constant 0 : index
      %86 = vector.load %arg13[%c0_45, %c0_46] : memref<8x18xf32, #tpu.memory_space<vmem>>, vector<8x18xf32>
      %87 = vector.shape_cast %86 : vector<8x18xf32> to vector<1x8x18xf32>
      %cst_47 = arith.constant dense<0.000000e+00> : vector<1xf32>
      %88 = vector.multi_reduction <add>, %87, %cst_47 [1, 2] : vector<1x8x18xf32> to vector<1xf32>
      %89 = vector.shape_cast %88 : vector<1xf32> to vector<1x1x1xf32>
      %90 = vector.extract %89[0, 0, 0] : f32 from vector<1x1x1xf32>
      %91 = arith.mulf %85, %90 : f32
      %92 = arith.addf %84, %91 : f32
      %93 = vector.broadcast %92 : f32 to vector<1x8x128xf32>
      %c0_48 = arith.constant 0 : index
      %c0_49 = arith.constant 0 : index
      %c0_50 = arith.constant 0 : index
      %94 = vector.load %arg11[%c0_48, %c0_49, %c0_50] : memref<1x8x128xf32, #tpu.memory_space<vmem>>, vector<1x8x128xf32>
      tpu.vector_store %arg11[%c0_48, %c0_49, %c0_50], %93 {strides = array<i32>} : memref<1x8x128xf32, #tpu.memory_space<vmem>>, vector<1x8x128xf32>,
    } else {
    }
    return
  }
  func.func @transform_0(%arg0: i32, %arg1: i32, %arg2: memref<2xf32, #tpu.memory_space<smem>>) -> (i32, i32) {
    %c1_i32 = arith.constant 1 : i32
    %0 = arith.muli %arg0, %c1_i32 : i32
    %1 = arith.addi %0, %arg1 : i32
    %c0_i32 = arith.constant 0 : i32
    %c0_i32_0 = arith.constant 0 : i32
    return %1, %c0_i32 : i32, i32
  }
  func.func @transform_1(%arg0: i32, %arg1: i32, %arg2: memref<2xf32, #tpu.memory_space<smem>>) -> (i32, i32) {
    %c1_i32 = arith.constant 1 : i32
    %0 = arith.muli %arg0, %c1_i32 : i32
    %1 = arith.addi %0, %arg1 : i32
    %c0_i32 = arith.constant 0 : i32
    %c0_i32_0 = arith.constant 0 : i32
    return %1, %c0_i32 : i32, i32
  }
  func.func @transform_2(%arg0: i32, %arg1: i32, %arg2: memref<2xf32, #tpu.memory_space<smem>>) -> (i32, i32) {
    %c1_i32 = arith.constant 1 : i32
    %0 = arith.muli %arg0, %c1_i32 : i32
    %1 = arith.addi %0, %arg1 : i32
    %c0_i32 = arith.constant 0 : i32
    %c0_i32_0 = arith.constant 0 : i32
    return %1, %c0_i32 : i32, i32
  }
  func.func @transform_3(%arg0: i32, %arg1: i32, %arg2: memref<2xf32, #tpu.memory_space<smem>>) -> (i32, i32) {
    %c1_i32 = arith.constant 1 : i32
    %0 = arith.muli %arg0, %c1_i32 : i32
    %1 = arith.addi %0, %arg1 : i32
    %c0_i32 = arith.constant 0 : i32
    %c0_i32_0 = arith.constant 0 : i32
    return %1, %c0_i32 : i32, i32
  }
  func.func @transform_4(%arg0: i32, %arg1: i32, %arg2: memref<2xf32, #tpu.memory_space<smem>>) -> (i32, i32) {
    %c1_i32 = arith.constant 1 : i32
    %0 = arith.muli %arg0, %c1_i32 : i32
    %1 = arith.addi %0, %arg1 : i32
    %c0_i32 = arith.constant 0 : i32
    %c0_i32_0 = arith.constant 0 : i32
    return %1, %c0_i32 : i32, i32
  }
  func.func @transform_5(%arg0: i32, %arg1: i32, %arg2: memref<2xf32, #tpu.memory_space<smem>>) -> (i32, i32) {
    %c1_i32 = arith.constant 1 : i32
    %0 = arith.muli %arg0, %c1_i32 : i32
    %1 = arith.addi %0, %arg1 : i32
    %c0_i32 = arith.constant 0 : i32
    %c0_i32_0 = arith.constant 0 : i32
    return %1, %c0_i32 : i32, i32
  }
  func.func @transform_6(%arg0: i32, %arg1: i32, %arg2: memref<2xf32, #tpu.memory_space<smem>>) -> (i32, i32) {
    %c1_i32 = arith.constant 1 : i32
    %0 = arith.muli %arg0, %c1_i32 : i32
    %1 = arith.addi %0, %arg1 : i32
    %c0_i32 = arith.constant 0 : i32
    %c0_i32_0 = arith.constant 0 : i32
    return %1, %c0_i32 : i32, i32
  }
  func.func @transform_7(%arg0: i32, %arg1: i32, %arg2: memref<2xf32, #tpu.memory_space<smem>>) -> (i32, i32) {
    %c1_i32 = arith.constant 1 : i32
    %0 = arith.muli %arg0, %c1_i32 : i32
    %1 = arith.addi %0, %arg1 : i32
    %c0_i32 = arith.constant 0 : i32
    %c0_i32_0 = arith.constant 0 : i32
    return %1, %c0_i32 : i32, i32
  }
  func.func @transform_8(%arg0: i32, %arg1: i32, %arg2: memref<2xf32, #tpu.memory_space<smem>>) -> (i32, i32, i32) {
    %c0_i32 = arith.constant 0 : i32
    %c0_i32_0 = arith.constant 0 : i32
    %c0_i32_1 = arith.constant 0 : i32
    return %arg0, %c0_i32, %c0_i32_0 : i32, i32, i32
  }
}

</mosaic_0001>

<bundles_post_ra>
// kernel: tpu_custom_call.1
= control target key start
LH: loop header
LB: loop body
LE: loop exit
PB: predicated region body
PF: predicated region fallthrough
CT: control target
= control target key end

     0   :  { %s810_s12 = smov [#allocation5]   ;;  %s935_s0 = inlined_call_operand.hbm [shape: f32[2], index: 0, kind: input, shape index: {}]   ;;  %s936_s1 = inlined_call_operand.hbm [shape: f32[16,10], index: 1, kind: input, shape index: {}]   ;;  %s937_s2 = inlined_call_operand.hbm [shape: s8[16,10], index: 2, kind: input, shape index: {}]   ;;  %s938_s3 = inlined_call_operand.hbm [shape: f32[16,10], index: 3, kind: input, shape index: {}]   ;;  %s939_s4 = inlined_call_operand.hbm [shape: s8[16,10], index: 4, kind: input, shape index: {}]   ;;  %s940_s5 = inlined_call_operand.hbm [shape: f32[16,18], index: 5, kind: input, shape index: {}]   ;;  %s941_s6 = inlined_call_operand.vmem [shape: s8[16,18], index: 6, kind: input, shape index: {}]   ;;  %s942_s7 = inlined_call_operand.hbm [shape: f32[16,18], index: 7, kind: input, shape index: {}]   ;;  %s943_s8 = inlined_call_operand.hbm [shape: s8[16,18], index: 8, kind: input, shape index: {}]   ;;  %s944_s9 = inlined_call_operand.hbm [shape: f32[1,8,128], index: 9, kind: output, shape index: {}]  }
   0x1   :  { %s15_s11 = sshll.u32 %s935_s0, 4  ;;  %s16_s11 = int_to_ptr.hbm [resolvable:$true] %s15_s11 }
   0x2   :  { %18 = dma.hbm_to_smem %s16_s11, 16, %s810_s12, [#allocation4] }
   0x3   :  { %798 = dma.done.wait [#allocation4], 16 }
   0x4   :  { %799 = vsyncadd [#allocation4], 4294967280 }
   0x5   :  { %21 = sfence }
   0x6   :  { %22 = vsyncpa [#allocation7], 0 }
   0x7   :  { %23 = vsyncpa [#allocation10], 0 }
   0x8   :  { %24 = vsyncpa [#allocation13], 0 }
   0x9   :  { %25 = vsyncpa [#allocation16], 0 }
   0xa   :  { %26 = vsyncpa [#allocation8], 0 }
   0xb   :  { %35 = vsyncadd [#allocation7], 256  ;;  %s40_s15 = sshll.u32 %s936_s1, 4  ;;  %s811_s16 = smov [#allocation6]   ;;  %s41_s15 = int_to_ptr.hbm [resolvable:$true] %s40_s15 }
   0xc   :  { %s42_s17 = sshll.u32 %s811_s16, 4  ;;  %s812_s0 = smov 128   ;;  %s43_s17 = int_to_ptr.vmem [resolvable:$true] %s42_s17 }
   0xd   :  { %s813_s18 = smov 8  }
   0xe   :  { %48 = dma.hbm_to_vmem [thread:$0]  %s41_s15, 256, %s43_s17, [#allocation7], %s812_s0, %s812_s0, %s813_s18  }
   0xf   :  { %57 = vsyncadd [#allocation10], 64  ;;  %s62_s21 = sshll.u32 %s937_s2, 4  ;;  %s814_s22 = smov [#allocation9]   ;;  %s63_s21 = int_to_ptr.hbm [resolvable:$true] %s62_s21 }
  0x10   :  { %s64_s23 = sshll.u32 %s814_s22, 4  ;;  %s815_s1 = smov 32   ;;  %s65_s23 = int_to_ptr.vmem [resolvable:$true] %s64_s23 }
  0x11   :  { %s816_s24 = smov 2  }
  0x12   :  { %70 = dma.hbm_to_vmem [thread:$0]  %s63_s21, 64, %s65_s23, [#allocation10], %s815_s1, %s815_s1, %s816_s24  }
  0x13   :  { %79 = vsyncadd [#allocation10], 256  ;;  %s84_s27 = sshll.u32 %s938_s3, 4  ;;  %s817_s28 = smov [#allocation11]   ;;  %s85_s27 = int_to_ptr.hbm [resolvable:$true] %s84_s27 }
  0x14   :  { %s86_s29 = sshll.u32 %s817_s28, 4  ;;  %s87_s29 = int_to_ptr.vmem [resolvable:$true] %s86_s29 }
  0x15   :  { %92 = dma.hbm_to_vmem [thread:$0]  %s85_s27, 256, %s87_s29, [#allocation10], %s812_s0, %s812_s0, %s813_s18  }
  0x16   :  { %101 = vsyncadd [#allocation13], 64  ;;  %s106_s10 = sshll.u32 %s939_s4, 4  ;;  %s818_s11 = smov [#allocation12]   ;;  %s107_s10 = int_to_ptr.hbm [resolvable:$true] %s106_s10 }
  0x17   :  { %s108_s12 = sshll.u32 %s818_s11, 4  ;;  %s109_s12 = int_to_ptr.vmem [resolvable:$true] %s108_s12 }
  0x18   :  { %114 = dma.hbm_to_vmem [thread:$0]  %s107_s10, 64, %s109_s12, [#allocation13], %s815_s1, %s815_s1, %s816_s24  }
  0x19   :  { %123 = vsyncadd [#allocation13], 256  ;;  %s128_s14 = sshll.u32 %s940_s5, 4  ;;  %s819_s15 = smov [#allocation14]   ;;  %s129_s14 = int_to_ptr.hbm [resolvable:$true] %s128_s14 }
  0x1a   :  { %s130_s16 = sshll.u32 %s819_s15, 4  ;;  %s131_s16 = int_to_ptr.vmem [resolvable:$true] %s130_s16 }
  0x1b   :  { %136 = dma.hbm_to_vmem [thread:$0]  %s129_s14, 256, %s131_s16, [#allocation13], %s812_s0, %s812_s0, %s813_s18  }
  0x1c   :  { %159 = vsyncadd [#allocation16], 256  ;;  %s164_s19 = sshll.u32 %s942_s7, 4  ;;  %s820_s20 = smov [#allocation15]   ;;  %s165_s19 = int_to_ptr.hbm [resolvable:$true] %s164_s19 }
  0x1d   :  { %s166_s21 = sshll.u32 %s820_s20, 4  ;;  %s167_s21 = int_to_ptr.vmem [resolvable:$true] %s166_s21 }
  0x1e   :  { %172 = dma.hbm_to_vmem [thread:$0]  %s165_s19, 256, %s167_s21, [#allocation16], %s812_s0, %s812_s0, %s813_s18  }
  0x1f   :  { %181 = vsyncadd [#allocation16], 64  ;;  %s186_s23 = sshll.u32 %s943_s8, 4  ;;  %s821_s25 = smov [#allocation17]   ;;  %s187_s23 = int_to_ptr.hbm [resolvable:$true] %s186_s23 }
  0x20   :  { %s188_s26 = sshll.u32 %s821_s25, 4  ;;  %s189_s26 = int_to_ptr.vmem [resolvable:$true] %s188_s26 }
  0x21   :  { %194 = dma.hbm_to_vmem [thread:$0]  %s187_s23, 64, %s189_s26, [#allocation16], %s815_s1, %s815_s1, %s816_s24  }
  0x22   :  { %800 = dma.done.wait [#allocation7], 512  }
  0x23   :  { %801 = vsyncadd [#allocation7], 4294966784 }
  0x24   :  { %802 = dma.done.wait [#allocation10], 640  }
  0x25   :  { %803 = vsyncadd [#allocation10], 4294966656 }
  0x26   :  { %804 = dma.done.wait [#allocation13], 640  }
  0x27   :  { %805 = vsyncadd [#allocation13], 4294966656 }
  0x28   :  { %806 = dma.done.wait [#allocation16], 640  }
  0x29   :  { %807 = vsyncadd [#allocation16], 4294966656  ;;  %vm275_vm0 = vcmask 80896   ;;  %vm277_vm1 = vcmask 146432   ;;  %v822_v0 = vmov 0.0   ;;  %v283_v2 = vld [vmem:[#allocation6] sm:$0xff] }
  0x2a   :  { %276 = vst.msk [vmem:[#allocation2] sm:$0xff] %vm275_vm0, %v822_v0  ;;  %v545_v1 = vld [vmem:[#allocation9] sm:$0xf]   ;;  %v284_v3 = vld [vmem:[#allocation6 + $0x8] sm:$0xff]  ;;  %v295_v6 = vsub.f32 1.0, %v283_v2  ;;  %v320_v10 = vld [vmem:[#allocation11 + $0x8] sm:$0xff] }
  0x2b   :  { %278 = vst.msk [vmem:[#allocation3] sm:$0xff] %vm277_vm1, %v822_v0  ;;  %v546_v4 = vunpack.c.0.s8 %v545_v1  ;;  %v547_v5 = vunpack.c.1.s8 %v545_v1  ;;  %v296_v7 = vsub.f32 1.0, %v284_v3  ;;  %v549_v8 = vld [vmem:[#allocation12] sm:$0xf]   ;;  %v332_v14 = vsub.f32 1.0, %v320_v10  ;;  %v359_v18 = vld [vmem:[#allocation14] sm:$0xff] }
  0x2c   :  { %v319_v9 = vld [vmem:[#allocation11] sm:$0xff]  ;;  %v550_v11 = vunpack.c.0.s8 %v549_v8  ;;  %v551_v12 = vunpack.c.1.s8 %v549_v8  ;;  %v553_v15 = vld [vmem:[%s941_s6] sm:$0xf]   ;;  %v360_v19 = vld [vmem:[#allocation14 + $0x8] sm:$0xff]  ;;  %v371_v27 = vsub.f32 1.0, %v359_v18  ;;  %s488_s6 = sld [smem:[#allocation5]] }
  0x2d   :  { %v331_v13 = vsub.f32 1.0, %v319_v9  ;;  %vm291_vm2 = vcmp.ne.s32.totalorder %v546_v4, 0  ;;  %vm292_vm3 = vcmp.ne.s32.totalorder %v547_v5, 0  ;;  %v554_v16 = vunpack.c.0.s8 %v553_v15  ;;  %v557_v22 = vld [vmem:[#allocation17] sm:$0xf]   ;;  %v396_v26 = vld [vmem:[#allocation15 + $0x8] sm:$0xff] }
  0x2e   :  { %v555_v17 = vunpack.c.1.s8 %v553_v15  ;;  %v299_v20 = vsel %vm291_vm2, %v283_v2, %v295_v6  ;;  %v300_v21 = vsel %vm292_vm3, %v284_v3, %v296_v7  ;;  %vm327_vm4 = vcmp.ne.s32.totalorder %v550_v11, 0  ;;  %v395_v23 = vld [vmem:[#allocation15] sm:$0xff]  ;;  %s543_s0 = sld [smem:[#allocation5 + $0x1]]  ;;  %s823_s1 = smov [#allocation18]  }
  0x2f   :  { %vm328_vm5 = vcmp.ne.s32.totalorder %v551_v12, 0  ;;  %578 = vlog2.f32 %v299_v20  ;;  %v335_v24 = vsel %vm327_vm4, %v319_v9, %v331_v13  ;;  %vm367_vm6 = vcmp.ne.s32.totalorder %v554_v16, 0  ;;  %s522_s24 = sshll.u32 %s823_s1, 4  ;;  %s524_s10 = sshll.u32 %s944_s9, 4  ;;  %s523_s24 = int_to_ptr.vmem [resolvable:$true] %s522_s24  ;;  %s525_s10 = int_to_ptr.hbm [resolvable:$true] %s524_s10 }
  0x30   :  { %v336_v25 = vsel %vm328_vm5, %v320_v10, %v332_v14  ;;  %580 = vlog2.f32 %v300_v21  ;;  %vm368_vm7 = vcmp.ne.s32.totalorder %v555_v17, 0  ;;  %v372_v28 = vsub.f32 1.0, %v360_v19 }
  0x31   :  { %582 = vlog2.f32 %v335_v24  ;;  %v558_v29 = vunpack.c.0.s8 %v557_v22  ;;  %v559_v30 = vunpack.c.1.s8 %v557_v22  ;;  %v407_v31 = vsub.f32 1.0, %v395_v23  ;;  %v463_v63 = vld [vmem:[#allocation2] sm:$0xff] }
  0x32   :  { %584 = vlog2.f32 %v336_v25  ;;  %v375_v32 = vsel %vm367_vm6, %v359_v18, %v371_v27  ;;  %v376_v33 = vsel %vm368_vm7, %v360_v19, %v372_v28  ;;  %v408_v34 = vsub.f32 1.0, %v396_v26  ;;  %v474_v7 = vld [vmem:[#allocation3] sm:$0xff] }
  0x33   :  { %586 = vlog2.f32 %v375_v32  ;;  %vm403_vm8 = vcmp.ne.s32.totalorder %v558_v29, 0  ;;  %vm404_vm9 = vcmp.ne.s32.totalorder %v559_v30, 0 }
  0x34   :  { %588 = vlog2.f32 %v376_v33  ;;  %v411_v35 = vsel %vm403_vm8, %v395_v23, %v407_v31  ;;  %v412_v36 = vsel %vm404_vm9, %v396_v26, %v408_v34 }
  0x35   :  { %v579_v37 = vpop.eup %578  ;;  %590 = vlog2.f32 %v411_v35 }
  0x36   :  { %v581_v38 = vpop.eup %580  ;;  %v304_v39 = vmul.f32 0.6931472, %v579_v37  ;;  %592 = vlog2.f32 %v412_v36 }
  0x37   :  { %v583_v40 = vpop.eup %582  ;;  %v306_v41 = vmul.f32 0.6931472, %v581_v38 }
  0x38   :  { %v585_v42 = vpop.eup %584  ;;  %v311_v43 = vmax.f32 %v304_v39, -100.0  ;;  %v340_v44 = vmul.f32 0.6931472, %v583_v40 }
  0x39   :  { %v587_v45 = vpop.eup %586  ;;  %v312_v46 = vmax.f32 %v306_v41, -100.0  ;;  %v342_v47 = vmul.f32 0.6931472, %v585_v42 }
  0x3a   :  { %v589_v48 = vpop.eup %588  ;;  %v347_v49 = vmax.f32 %v340_v44, -100.0  ;;  %v380_v50 = vmul.f32 0.6931472, %v587_v45 }
  0x3b   :  { %v591_v51 = vpop.eup %590  ;;  %v348_v52 = vmax.f32 %v342_v47, -100.0  ;;  %v382_v53 = vmul.f32 0.6931472, %v589_v48 }
  0x3c   :  { %v593_v54 = vpop.eup %592  ;;  %v351_v55 = vadd.f32 %v347_v49, %v311_v43  ;;  %v387_v56 = vmax.f32 %v380_v50, -100.0  ;;  %v416_v57 = vmul.f32 0.6931472, %v591_v51 }
  0x3d   :  { %v352_v58 = vadd.f32 %v348_v52, %v312_v46  ;;  %v388_v59 = vmax.f32 %v382_v53, -100.0  ;;  %v418_v60 = vmul.f32 0.6931472, %v593_v54 }
  0x3e   :  { %v465_v61 = vsel %vm275_vm0, %v351_v55, 0.0  ;;  %v423_v62 = vmax.f32 %v416_v57, -100.0 }
  0x3f   :  { %v466_v0 = vsel %vm275_vm0, %v352_v58, 0.0  ;;  %v424_v1 = vmax.f32 %v418_v60, -100.0 }
  0x40   :  { %v467_v2 = vadd.f32 %v466_v0, %v465_v61  ;;  %v427_v3 = vadd.f32 %v423_v62, %v387_v56 }
  0x41   :  { %v428_v4 = vadd.f32 %v424_v1, %v388_v59 }
  0x42   :  { %v472_v5 = vadd.f32 %v467_v2, %v463_v63  ;;  %v476_v6 = vsel %vm277_vm1, %v427_v3, 0.0 }
  0x43   :  { %v477_v8 = vsel %vm277_vm1, %v428_v4, 0.0 }
  0x44   :  { %473 = vst.msk [vmem:[#allocation2] sm:$0xff] %vm275_vm0, %v472_v5  ;;  %v478_v9 = vadd.f32 %v477_v8, %v476_v6 }
  0x46   :  { %v483_v10 = vadd.f32 %v478_v9, %v474_v7 }
  0x48   :  { %484 = vst.msk [vmem:[#allocation3] sm:$0xff] %vm277_vm1, %v483_v10 }
  0x4b   :  { %v489_v11 = vld [vmem:[#allocation2] sm:$0xff] }
  0x4c   :  { %v490_v12 = vsel %vm275_vm0, %v489_v11, 0.0 }
  0x4d   :  { %491 = vadd.xlane.f32.xlu0 %v490_v12 }
  0x4f   :  { %v502_v13 = vld [vmem:[#allocation3] sm:$0xff] }
  0x50   :  { %v503_v14 = vsel %vm277_vm1, %v502_v13, 0.0 }
  0x55   :  { %504 = vadd.xlane.f32.xlu0 %v503_v14 }
  0xc0   :  { %v492_v15 = vpop.xlane.xlu0 %491 }
  0xc1   :  { %v493_v16 = vrot.slane %v492_v15, 4 }
  0xc3   :  { %v494_v17 = vadd.f32 %v493_v16, %v492_v15 }
  0xc5   :  { %v495_v18 = vrot.slane %v494_v17, 2 }
  0xc7   :  { %v496_v19 = vadd.f32 %v495_v18, %v494_v17 }
  0xc8   :  { %v505_v20 = vpop.xlane.xlu0 %504 }
  0xc9   :  { %v506_v21 = vrot.slane %v505_v20, 4  ;;  %v497_v22 = vrot.slane %v496_v19, 1 }
  0xcb   :  { %v507_v23 = vadd.f32 %v506_v21, %v505_v20  ;;  %v498_v24 = vadd.f32 %v497_v22, %v496_v19 }
  0xcd   :  { %v508_v25 = vrot.slane %v507_v23, 2  ;;  %560 = vpush %v498_v24 }
  0xcf   :  { %v509_v26 = vadd.f32 %v508_v25, %v507_v23 }
  0xd1   :  { %v510_v27 = vrot.slane %v509_v26, 1 }
  0xd3   :  { %v511_v28 = vadd.f32 %v510_v27, %v509_v26 }
  0xd5   :  { %562 = vpush %v511_v28 }
  0xfe   :  { %s561_s18 = spop %560 }
  0xff   :  { %s500_s27 = smul.f32 %s561_s18, %s488_s6 }
 0x106   :  { %s563_s28 = spop %562 }
 0x107   :  { %s513_s29 = smul.f32 %s563_s28, %s543_s0 }
 0x109   :  { %s514_s11 = sadd.f32 %s513_s29, %s500_s27 }
 0x10b   :  { %v515_v29 = vstv %s514_s11 }
 0x10c   :  { %516 = vst [vmem:[#allocation18] sm:$0xff] %v515_v29 }
 0x10d   :  { %527 = dma.vmem_to_hbm [thread:$0]  %s523_s24, 128, %s525_s10, [#allocation8]  }
 0x10e   :  { %808 = dma.done.wait [#allocation8], 128  }
 0x10f   :  { %809 = vsyncadd [#allocation8], 4294967168 }
 0x110   :  { %532 = vsyncpa [#allocation7], 1 }
 0x111   :  { %533 = vsyncpa [#allocation10], 1 }
 0x112   :  { %534 = vsyncpa [#allocation13], 1 }
 0x113   :  { %535 = vsyncpa [#allocation16], 1 }
 0x114   :  { %536 = vsyncpa [#allocation8], 1 }

</bundles_post_ra>
